<compile_context>
chip_gen: v6e
topology: v6e:2x2x1
jax: 0.10.0
libtpu: 0.0.40
codegen_flags: <defaults>
</compile_context>

<pallas_src>
import jax
import jax.numpy as jnp
from jax.experimental import pallas as pl
from jax.experimental.pallas import tpu as pltpu


def _round_up(x, m):
    return ((x + m - 1) // m) * m


def backbone_kernel(x_ref, w1t_ref, b1_ref, w2t_ref, b2_ref, o_ref):
    # x_ref:   (1, C, BM)   activation tile in native channel-first layout
    # w1t_ref: (H, C)       layer-1 weight (transposed), VMEM-resident
    # b1_ref:  (H, 1)
    # w2t_ref: (OC, H)      layer-2 weight (transposed), VMEM-resident
    # b2_ref:  (OC, 1)
    # o_ref:   (1, OC, BM)  lane-dense output tile (rows on the lane axis)
    x = x_ref[0]                       # (C, BM)
    w1t = w1t_ref[...]                 # (H, C)

    c = x.shape[0]
    h_dim = w1t.shape[0]
    bm = x.shape[1]

    # Layer 1: contraction over C (tiny, e.g. 3) -> unrolled VPU broadcast-FMAs.
    # An MXU pass with K=3 would be nearly empty, so keep it on the VPU.
    h = jnp.zeros((h_dim, bm), dtype=jnp.float32)
    for ci in range(c):
        h = h + w1t[:, ci:ci + 1] * x[ci:ci + 1, :]
    h = h + b1_ref[...]                # (H, 1) broadcasts over lanes
    h = jnp.maximum(h, 0.0)            # ReLU on the VPU

    # Layer 2: K = HIDDEN on the MXU, f32 accumulation.
    out = jnp.dot(w2t_ref[...], h, preferred_element_type=jnp.float32) + b2_ref[...]
    o_ref[0] = out.astype(o_ref.dtype)


def backbone_forward(x_nctv, w1, b1, w2, b2, *, tm=8192, core_parallel=False):
    """x_nctv: (N, C, T, V) float32 -> (N, out_channel, T, V) float32.

    tm: row-tile cap. 8192 is safe on every generation (v5e's 16 MiB scoped VMEM default);
        use 16384 on v6e/v7x for lower per-step overhead.
    core_parallel: set True on v7x to shard the batch axis across the 2 TensorCores.
    """
    n, c, t, v = x_nctv.shape
    hidden = w1.shape[1]
    out_ch = w2.shape[1]
    rows = t * v

    # Free, contiguous reshape only -- no transpose, no pad.
    x_flat = x_nctv.reshape(n, c, rows).astype(jnp.float32)

    # Row-tile width: either the full T*V dim (exempt from 128-divisibility, pad-free)
    # or a multiple of 128 so output stores stay lane-dense / unmasked.
    if rows <= tm:
        bm = rows
    else:
        bm = _round_up(min(tm, rows), 128)
    grid = (n, pl.cdiv(rows, bm))

    cost = pl.CostEstimate(
        flops=2 * n * rows * (c * hidden + hidden * out_ch),
        transcendentals=0,
        bytes_accessed=4 * (n * rows * (c + out_ch)
                            + c * hidden + hidden * out_ch + hidden + out_ch),
    )

    dim_sem = (
        pltpu.CORE_PARALLEL if core_parallel else pltpu.PARALLEL,  # batch axis
        pltpu.PARALLEL,                                            # row-tile axis
    )

    out_flat = pl.pallas_call(
        backbone_kernel,
        out_shape=jax.ShapeDtypeStruct((n, out_ch, rows), jnp.float32),
        grid_spec=pl.GridSpec(
            grid=grid,
            in_specs=[
                pl.BlockSpec((1, c, bm), lambda ni, ri: (ni, 0, ri)),      # activations
                pl.BlockSpec((hidden, c), lambda ni, ri: (0, 0)),          # W1^T resident
                pl.BlockSpec((hidden, 1), lambda ni, ri: (0, 0)),          # b1  resident
                pl.BlockSpec((out_ch, hidden), lambda ni, ri: (0, 0)),     # W2^T resident
                pl.BlockSpec((out_ch, 1), lambda ni, ri: (0, 0)),          # b2  resident
            ],
            out_specs=pl.BlockSpec((1, out_ch, bm), lambda ni, ri: (ni, 0, ri)),
        ),
        compiler_params=pltpu.CompilerParams(
            dimension_semantics=dim_sem,
            vmem_limit_bytes=48 * 1024 * 1024,  # headroom for large tiles on all gens
        ),
        cost_estimate=cost,
    )(x_flat, w1.T, b1.reshape(hidden, 1), w2.T, b2.reshape(out_ch, 1))

    # Free reshape back to the module's (N, OC, T, V) output layout.
    return out_flat.reshape(n, out_ch, t, v)


if __name__ == "__main__":
    # Module implies: non-kinetics dataset -> ch = 3 input channels; skeleton layout (N, C, T, V).
    N, C, T, V = 2, 3, 8, 16
    HIDDEN = 32
    OUT_CHANNEL = 64

    key = jax.random.PRNGKey(0)
    kx, kw1, kb1, kw2, kb2 = jax.random.split(key, 5)

    x = jax.random.normal(kx, (N, C, T, V), dtype=jnp.float32)

    # Deterministic parameter init (synthetic backbone weights).
    w1 = jax.random.normal(kw1, (C, HIDDEN), dtype=jnp.float32) * 0.1
    b1 = jax.random.normal(kb1, (HIDDEN,), dtype=jnp.float32) * 0.01
    w2 = jax.random.normal(kw2, (HIDDEN, OUT_CHANNEL), dtype=jnp.float32) * 0.1
    b2 = jax.random.normal(kb2, (OUT_CHANNEL,), dtype=jnp.float32) * 0.01

    out = backbone_forward(x, w1, b1, w2, b2)
    out = jax.block_until_ready(out)

    # Sanity check against a pure-JAX reference of the same stand-in backbone.
    x_rows = jnp.transpose(x, (0, 2, 3, 1)).reshape(N * T * V, C)
    ref_rows = jnp.maximum(x_rows @ w1 + b1, 0.0) @ w2 + b2
    ref = jnp.transpose(ref_rows.reshape(N, T, V, OUT_CHANNEL), (0, 3, 1, 2))
    assert out.shape == (N, OUT_CHANNEL, T, V)
    assert jnp.allclose(out, ref, atol=1e-5, rtol=1e-5)

    print("KERNEL_OK")
</pallas_src>

<mosaic_0001>
module attributes {stable_mosaic.version = 11 : i64} {
  func.func @backbone_kernel(%arg0: i32, %arg1: i32, %arg2: memref<1x3x128xf32, #tpu.memory_space<vmem>>, %arg3: memref<32x3xf32, #tpu.memory_space<vmem>>, %arg4: memref<32x1xf32, #tpu.memory_space<vmem>>, %arg5: memref<64x32xf32, #tpu.memory_space<vmem>>, %arg6: memref<64x1xf32, #tpu.memory_space<vmem>>, %arg7: memref<1x64x128xf32, #tpu.memory_space<vmem>>) attributes {dimension_semantics = [#tpu.dimension_semantics<parallel>, #tpu.dimension_semantics<parallel>], iteration_bounds = array<i64: 2, 1>, scalar_prefetch = 0 : i64, scratch_operands = 0 : i64, tpu.core_type = #tpu.core_type<tc>, window_params = [{transform_indices = @transform_0, window_bounds = array<i64: 1, 3, 128>}, {pipeline_mode = #tpu.pipeline_mode<synchronous>, transform_indices = @transform_1, window_bounds = array<i64: 32, 3>}, {pipeline_mode = #tpu.pipeline_mode<synchronous>, transform_indices = @transform_2, window_bounds = array<i64: 32, 1>}, {pipeline_mode = #tpu.pipeline_mode<synchronous>, transform_indices = @transform_3, window_bounds = array<i64: 64, 32>}, {pipeline_mode = #tpu.pipeline_mode<synchronous>, transform_indices = @transform_4, window_bounds = array<i64: 64, 1>}, {transform_indices = @transform_5, window_bounds = array<i64: 1, 64, 128>}]} {
    %c0 = arith.constant 0 : index
    %c0_0 = arith.constant 0 : index
    %c0_1 = arith.constant 0 : index
    %0 = vector.load %arg2[%c0, %c0_0, %c0_1] : memref<1x3x128xf32, #tpu.memory_space<vmem>>, vector<1x3x128xf32>
    %1 = vector.shape_cast %0 : vector<1x3x128xf32> to vector<3x128xf32>
    %c0_2 = arith.constant 0 : index
    %c0_3 = arith.constant 0 : index
    %2 = vector.load %arg3[%c0_2, %c0_3] : memref<32x3xf32, #tpu.memory_space<vmem>>, vector<32x3xf32>
    %cst = arith.constant 0.000000e+00 : f32
    %3 = vector.broadcast %cst : f32 to vector<32x128xf32>
    %4 = vector.extract_strided_slice %2 {offsets = [0, 0], sizes = [32, 1], strides = [1, 1]} : vector<32x3xf32> to vector<32x1xf32>
    %5 = vector.extract_strided_slice %1 {offsets = [0, 0], sizes = [1, 128], strides = [1, 1]} : vector<3x128xf32> to vector<1x128xf32>
    %6 = vector.broadcast %4 : vector<32x1xf32> to vector<32x128xf32>
    %7 = vector.broadcast %5 : vector<1x128xf32> to vector<32x128xf32>
    %8 = arith.mulf %6, %7 : vector<32x128xf32>
    %9 = arith.addf %3, %8 : vector<32x128xf32>
    %10 = vector.extract_strided_slice %2 {offsets = [0, 1], sizes = [32, 1], strides = [1, 1]} : vector<32x3xf32> to vector<32x1xf32>
    %11 = vector.extract_strided_slice %1 {offsets = [1, 0], sizes = [1, 128], strides = [1, 1]} : vector<3x128xf32> to vector<1x128xf32>
    %12 = vector.broadcast %10 : vector<32x1xf32> to vector<32x128xf32>
    %13 = vector.broadcast %11 : vector<1x128xf32> to vector<32x128xf32>
    %14 = arith.mulf %12, %13 : vector<32x128xf32>
    %15 = arith.addf %9, %14 : vector<32x128xf32>
    %16 = vector.extract_strided_slice %2 {offsets = [0, 2], sizes = [32, 1], strides = [1, 1]} : vector<32x3xf32> to vector<32x1xf32>
    %17 = vector.extract_strided_slice %1 {offsets = [2, 0], sizes = [1, 128], strides = [1, 1]} : vector<3x128xf32> to vector<1x128xf32>
    %18 = vector.broadcast %16 : vector<32x1xf32> to vector<32x128xf32>
    %19 = vector.broadcast %17 : vector<1x128xf32> to vector<32x128xf32>
    %20 = arith.mulf %18, %19 : vector<32x128xf32>
    %21 = arith.addf %15, %20 : vector<32x128xf32>
    %c0_4 = arith.constant 0 : index
    %c0_5 = arith.constant 0 : index
    %22 = vector.load %arg4[%c0_4, %c0_5] : memref<32x1xf32, #tpu.memory_space<vmem>>, vector<32x1xf32>
    %23 = vector.broadcast %22 : vector<32x1xf32> to vector<32x128xf32>
    %24 = arith.addf %21, %23 : vector<32x128xf32>
    %cst_6 = arith.constant 0.000000e+00 : f32
    %25 = vector.broadcast %cst_6 : f32 to vector<32x128xf32>
    %26 = arith.maximumf %24, %25 : vector<32x128xf32>
    %c0_7 = arith.constant 0 : index
    %c0_8 = arith.constant 0 : index
    %27 = vector.load %arg5[%c0_7, %c0_8] : memref<64x32xf32, #tpu.memory_space<vmem>>, vector<64x32xf32>
    %cst_9 = arith.constant dense<0.000000e+00> : vector<64x128xf32>
    %28 = tpu.matmul %27, %26, %cst_9 {dimension_numbers = #tpu.dot_dimension_numbers<[1], [0], [0], [1], [0, 0, 1, 1], [], []>} : vector<64x32xf32>, vector<32x128xf32>, vector<64x128xf32> -> vector<64x128xf32>
    %c0_10 = arith.constant 0 : index
    %c0_11 = arith.constant 0 : index
    %29 = vector.load %arg6[%c0_10, %c0_11] : memref<64x1xf32, #tpu.memory_space<vmem>>, vector<64x1xf32>
    %30 = vector.broadcast %29 : vector<64x1xf32> to vector<64x128xf32>
    %31 = arith.addf %28, %30 : vector<64x128xf32>
    %c0_12 = arith.constant 0 : index
    %c0_13 = arith.constant 0 : index
    %c0_14 = arith.constant 0 : index
    %32 = vector.load %arg7[%c0_12, %c0_13, %c0_14] : memref<1x64x128xf32, #tpu.memory_space<vmem>>, vector<1x64x128xf32>
    %33 = vector.shape_cast %32 : vector<1x64x128xf32> to vector<64x128xf32>
    %34 = vector.shape_cast %31 : vector<64x128xf32> to vector<1x64x128xf32>
    tpu.vector_store %arg7[%c0_12, %c0_13, %c0_14], %34 {strides = array<i32>} : memref<1x64x128xf32, #tpu.memory_space<vmem>>, vector<1x64x128xf32>,
    return
  }
  func.func @transform_0(%arg0: i32, %arg1: i32) -> (i32, i32, i32) {
    %c0_i32 = arith.constant 0 : i32
    %c0_i32_0 = arith.constant 0 : i32
    return %arg0, %c0_i32, %arg1 : i32, i32, i32
  }
  func.func @transform_1(%arg0: i32, %arg1: i32) -> (i32, i32) {
    %c0_i32 = arith.constant 0 : i32
    %c0_i32_0 = arith.constant 0 : i32
    %c0_i32_1 = arith.constant 0 : i32
    return %c0_i32, %c0_i32_0 : i32, i32
  }
  func.func @transform_2(%arg0: i32, %arg1: i32) -> (i32, i32) {
    %c0_i32 = arith.constant 0 : i32
    %c0_i32_0 = arith.constant 0 : i32
    %c0_i32_1 = arith.constant 0 : i32
    return %c0_i32, %c0_i32_0 : i32, i32
  }
  func.func @transform_3(%arg0: i32, %arg1: i32) -> (i32, i32) {
    %c0_i32 = arith.constant 0 : i32
    %c0_i32_0 = arith.constant 0 : i32
    %c0_i32_1 = arith.constant 0 : i32
    return %c0_i32, %c0_i32_0 : i32, i32
  }
  func.func @transform_4(%arg0: i32, %arg1: i32) -> (i32, i32) {
    %c0_i32 = arith.constant 0 : i32
    %c0_i32_0 = arith.constant 0 : i32
    %c0_i32_1 = arith.constant 0 : i32
    return %c0_i32, %c0_i32_0 : i32, i32
  }
  func.func @transform_5(%arg0: i32, %arg1: i32) -> (i32, i32, i32) {
    %c0_i32 = arith.constant 0 : i32
    %c0_i32_0 = arith.constant 0 : i32
    return %arg0, %c0_i32, %arg1 : i32, i32, i32
  }
}

</mosaic_0001>

<bundles_post_ra>
// kernel: tpu_custom_call.1
= control target key start
LH: loop header
LB: loop body
LE: loop exit
PB: predicated region body
PF: predicated region fallthrough
CT: control target
= control target key end

     0   :  { %10 = vsyncpa [#allocation3], 0  ;;  %s1099_s0 = inlined_call_operand.vmem [shape: f32[2,3,128], index: 0, kind: input, shape index: {}]   ;;  %s1100_s1 = inlined_call_operand.vmem [shape: f32[32,3], index: 1, kind: input, shape index: {}]   ;;  %s1101_s2 = inlined_call_operand.vmem [shape: f32[32,1], index: 2, kind: input, shape index: {}]   ;;  %s1102_s3 = inlined_call_operand.vmem [shape: f32[64,32], index: 3, kind: input, shape index: {}]   ;;  %s1103_s4 = inlined_call_operand.vmem [shape: f32[64,1], index: 4, kind: input, shape index: {}]   ;;  %s1104_s5 = inlined_call_operand.hbm [shape: f32[2,64,128], index: 5, kind: output, shape index: {}]  }
   0x1   :  { %12 = vsyncpa [#allocation3 + $0x1], 0  ;;  %s901_s18 = smov 0   ;;  %s903_s19 = smov 0  }
   0x2   :  { %s905_s20 = smov 0   ;;  %s907_s21 = smov 0  }
   0x3   :  { %s909_s22 = smov 0   ;;  %s911_s23 = smov 0  }
   0x4 LB: > { %s654_s24 = sadd.s32 4294967295, %s863_s23   ;;  %s655_s25 = sadd.s32 4294967294, %s863_s23   ;;  %s863_s23 = sphi %s911_s23, %s18_s23   ;;  %s859_s22 = sphi %s909_s22, %s1111_s22   ;;  %s855_s21 = sphi %s907_s21, %s1110_s21   ;;  %s851_s20 = sphi %s905_s20, %s1109_s20   ;;  %s847_s19 = sphi %s903_s19, %s1108_s19   ;;  %s843_s18 = sphi %s901_s18, %s1107_s18  }
   0x5   : > { %s30_s26 = sadd.s32 1, %s859_s22  ;;  %s151_s27 = sadd.s32 1, %s851_s20 }
   0x6   : > { %p32_p0 = scmp.ge.s32.totalorder %s30_s26, 2  ;;  %p161_p1 = scmp.ne.s32.totalorder %s851_s20, %s847_s19 }
   0x7   : > { %p162_p2 = scmp.eq.s32.totalorder %s654_s24, 1  ;;  %p167_p3 = scmp.ne.s32.totalorder %s847_s19, %s843_s18 }
   0x8   : > { %s1113_s26 = smov (%p32_p0, %s30_s26), 0  ;;  %p168_p5 = scmp.eq.s32.totalorder %s655_s25, 1 }
   0x9   : > { %p941_p4 = por %p162_p2, %p161_p1  ;;  %s146_s29 = ssub.s32 %s859_s22, %s1113_s26 }
   0xa   : > { %p658_p6 = scmp.ge.s32.totalorder %s863_s23, 1  ;;  %p149_p7 = scmp.eq.s32.totalorder %s146_s29, 0 }
   0xb   : > { %p948_p8 = por %p168_p5, %p167_p3  ;;  %p208_p9 = scmp.lt.s32.totalorder %s863_s23, 3 }
   0xc   : > { %s954_s6 = scalar_select %p149_p7, %s851_s20, %s151_s27  }
   0xd   : > { %p209_p10 = pnand %p658_p6, %p208_p9 }
   0xe   : > { %p238_p11 = scmp.lt.s32.totalorder (!%p209_p10), %s855_s21, 1  ;;  %s235_s15 = sand.u32 (!%p209_p10), 1, %s847_s19  }
   0xf   : > { %212 = sbr.rel (%p209_p10) target bundleno = 411 (0x19b), region = 40  ;;  %s659_s16 = sshll.u32 (!%p209_p10), %s235_s15, 6 }
  0x10   : > { %s674_s24 = sshll.u32 (!%p209_p10), %s855_s21, 10  ;;  %s868_s9 = smov (!%p209_p10), [#allocation2]  }
  0x11   : > { %s1048_s7 = scalar_lea.hbm (!%p209_p10), %s1104_s5, %s674_s24  ;;  %s791_s10 = sshll.u32 (!%p209_p10), %s868_s9, 4  ;;  %s792_s10 = int_to_ptr.vmem [resolvable:$false] %s791_s10 }
  0x12   : > { %s793_s11 = scalar_lea.vmem (!%p209_p10), %s792_s10, 2048 }
  0x14   : > { %v249_v0 = vld [vmem:[%s1100_s1 + $0x18] sm:$0xff]  ;;  %v248_v1 = vld [vmem:[%s1100_s1 + $0x10] sm:$0xff]  ;;  %v865_v2 = vmov 1   ;;  %v866_v3 = vmov 0   ;;  %v247_v4 = vld [vmem:[%s1100_s1 + $0x8] sm:$0xff]  ;;  %v867_v5 = vmov 2   ;;  %v270_v25 = vlaneseq }
  0x15   : > { %775 = vset.pattern.permute.xlu0 %v865_v2  ;;  %776 = vset.pattern.permute.xlu1 %v866_v3  ;;  %v246_v6 = vld [vmem:[%s1100_s1] sm:$0xff]  ;;  %v340_v7 = vld [vmem:[%s1101_s2 + $0x10] sm:$0xff]  ;;  %v341_v10 = vld [vmem:[%s1101_s2 + $0x18] sm:$0xff]  ;;  %vm426_vm0 = vcmask 261120   ;;  %s239_s13 = scalar_select %p238_p11, %s855_s21, 1 }
  0x16   : > { %295 = vperm.xlu0 %775, %v249_v0   ;;  %262 = vperm.xlu1 %776, %v248_v1   ;;  %v378_v8 = vld [vmem:[%s1103_s4] sm:$0xff]  ;;  %v380_v9 = vld [vmem:[%s1103_s4 + $0x10] sm:$0xff]  ;;  %v339_v13 = vld [vmem:[%s1101_s2 + $0x8] sm:$0xff]  ;;  %v271_v27 = vshrl.u32 %v270_v25, 7  ;;  %s1054_s21 = scalar_lea.sflag [#allocation3], %s235_s15 }
  0x17   : > { %v382_v11 = vld [vmem:[%s1103_s4 + $0x20] sm:$0xff]  ;;  %v384_v12 = vld [vmem:[%s1103_s4 + $0x30] sm:$0xff]  ;;  %v379_v17 = vld [vmem:[%s1103_s4 + $0x8] sm:$0xff]  ;;  %s660_s14 = sshll.u32 %s239_s13, 2 }
  0x18   : > { %v338_v14 = vld [vmem:[%s1101_s2] sm:$0xff]  ;;  %v381_v18 = vld [vmem:[%s1103_s4 + $0x18] sm:$0xff]  ;;  %v383_v19 = vld [vmem:[%s1103_s4 + $0x28] sm:$0xff]  ;;  %s244_s17 = scalar_lea.vmem %s1099_s0, %s660_s14  ;;  %v300_v29 = vsub.s32 1, %v271_v27  ;;  %v272_v30 = vsub.s32 0, %v271_v27  ;;  %v328_v34 = vsub.s32 2, %v271_v27 }
  0x19   : > { %v370_v15 = vld [vmem:[%s1102_s3] sm:$0xff]  ;;  %v385_v20 = vld [vmem:[%s1103_s4 + $0x38] sm:$0xff] }
  0x1a   : > { %782 = vset.pattern.permute.xlu0 %v867_v5  ;;  %777 = vset.pattern.permute.xlu1 %v865_v2  ;;  %v374_v16 = vld [vmem:[%s1102_s3 + $0x20] sm:$0xff] }
  0x1b   : > { %291 = vperm.xlu1 %777, %v248_v1   ;;  %315 = vperm.xlu0 %782, %v247_v4   ;;  %v245_v32 = vld [vmem:[%s244_s17] sm:$0x7]  ;;  %s237_s17 = scalar_lea.vmem [#allocation2], %s659_s16 }
  0x1c   : > { %695 = vmatprep.mubr.msk.f32.mxu0 %vm426_vm0, %v370_v15  ;;  %701 = vmatprep.mubr.msk.f32.mxu1 %vm426_vm0, %v374_v16  ;;  %v301_v33 = vrot.slane %v245_v32, %v300_v29  ;;  %v273_v36 = vrot.slane %v245_v32, %v272_v30  ;;  %v329_v40 = vrot.slane %v245_v32, %v328_v34  ;;  %v377_v15 = vld [vmem:[%s1102_s3 + $0x38] sm:$0xff]  ;;  %s579_s25 = sshll.u32 %s237_s17, 4  ;;  %s1050_s25 = int_to_ptr.vmem [resolvable:$true] %s579_s25 }
  0x1d   : > { %s787_s8 = scalar_lea.vmem %s1050_s25, 1024  ;;  %p794_p1 = scmp.lt.s32.totalorder %s1050_s25, %s792_s10 }
  0x1e   : > { %p788_p12 = scmp.ne.s32.totalorder %s1050_s25, %s787_s8  ;;  %p795_p2 = scmp.lt.s32.totalorder %s793_s11, %s787_s8 }
  0x1f   : > { %778 = vset.pattern.permute.xlu1 %v867_v5  ;;  %783 = vset.pattern.permute.xlu0 %v866_v3 }
  0x20   : > { %323 = vperm.xlu1 %778, %v249_v0   ;;  %267 = vperm.xlu0 %783, %v249_v0   ;;  %p789_p13 = pnand %p788_p12, %p941_p4  ;;  %p796_p3 = por %p795_p2, %p794_p1 }
  0x22   : > { %p790_p0 = pneg %p789_p13 }
  0x24   : > { %779 = vset.pattern.permute.xlu1 %v865_v2  ;;  %257 = vperm.xlu0 %783, %v247_v4   ;;  %p797_p5 = pnand %p796_p3, %p790_p0 }
  0x25   : > { %287 = vperm.xlu1 %779, %v247_v4  }
  0x28   : > { %252 = vperm.xlu0 %783, %v246_v6  }
  0x29   : > { %780 = vset.pattern.permute.xlu1 %v867_v5 }
  0x2a   : > { %319 = vperm.xlu1 %780, %v248_v1  }
  0x2c   : > { %354 = vperm.xlu0 %783, %v340_v7  }
  0x2e   : > { %781 = vset.pattern.permute.xlu1 %v865_v2 }
  0x2f   : > { %283 = vperm.xlu1 %781, %v246_v6  }
  0x30   : > { %388 = vperm.xlu0 %783, %v378_v8  }
  0x33   : > { %784 = vset.pattern.permute.xlu1 %v866_v3 }
  0x34   : > { %398 = vperm.xlu0 %783, %v380_v9   ;;  %359 = vperm.xlu1 %784, %v341_v10   ;;  %v371_v10 = vld [vmem:[%s1102_s3 + $0x8] sm:$0xff] }
  0x38   : > { %408 = vperm.xlu0 %783, %v382_v11   ;;  %785 = vset.pattern.permute.xlu1 %v867_v5  ;;  %v375_v11 = vld [vmem:[%s1102_s3 + $0x28] sm:$0xff] }
  0x39   : > { %311 = vperm.xlu1 %785, %v246_v6  }
  0x3c   : > { %418 = vperm.xlu0 %783, %v384_v12   ;;  %v372_v12 = vld [vmem:[%s1102_s3 + $0x10] sm:$0xff] }
  0x3d   : > { %786 = vset.pattern.permute.xlu1 %v866_v3 }
  0x3e   : > { %349 = vperm.xlu1 %786, %v339_v13   ;;  %v376_v13 = vld [vmem:[%s1102_s3 + $0x30] sm:$0xff] }
  0x42   : > { %344 = vperm.xlu1 %786, %v338_v14   ;;  %v373_v14 = vld [vmem:[%s1102_s3 + $0x18] sm:$0xff] }
  0x46   : > { %393 = vperm.xlu1 %786, %v379_v17  }
  0x4a   : > { %403 = vperm.xlu1 %786, %v381_v18  }
  0x4e   : > { %413 = vperm.xlu1 %786, %v383_v19  }
  0x52   : > { %423 = vperm.xlu1 %786, %v385_v20  }
  0x91   : > { %v263_v21 = vpop.permute.xlu1 %262  ;;  %v296_v22 = vpop.permute.xlu0 %295 }
  0x92   : > { %v305_v38 = vmul.f32 %v301_v33, %v296_v22  ;;  %v276_v42 = vmul.f32 %v273_v36, %v263_v21 }
  0x96   : > { %v292_v23 = vpop.permute.xlu1 %291  ;;  %v316_v24 = vpop.permute.xlu0 %315 }
  0x97   : > { %v304_v39 = vmul.f32 %v301_v33, %v292_v23  ;;  %v331_v58 = vmul.f32 %v329_v40, %v316_v24 }
  0x99   : > { %v308_v45 = vadd.f32 %v304_v39, %v276_v42 }
  0x9b   : > { %v324_v26 = vpop.permute.xlu1 %323  ;;  %v268_v28 = vpop.permute.xlu0 %267 }
  0x9c   : > { %v277_v41 = vmul.f32 %v273_v36, %v268_v28  ;;  %v333_v48 = vmul.f32 %v329_v40, %v324_v26 }
  0x9e   : > { %v309_v46 = vadd.f32 %v305_v38, %v277_v41 }
  0x9f   : > { %v258_v35 = vpop.permute.xlu0 %257 }
  0xa0   : > { %v288_v31 = vpop.permute.xlu1 %287  ;;  %v337_v50 = vadd.f32 %v333_v48, %v309_v46  ;;  %v275_v53 = vmul.f32 %v273_v36, %v258_v35 }
  0xa1   : > { %v303_v54 = vmul.f32 %v301_v33, %v288_v31 }
  0xa3   : > { %v253_v44 = vpop.permute.xlu0 %252  ;;  %v307_v59 = vadd.f32 %v303_v54, %v275_v53 }
  0xa4   : > { %v274_v62 = vmul.f32 %v273_v36, %v253_v44 }
  0xa5   : > { %v320_v37 = vpop.permute.xlu1 %319  ;;  %v335_v1 = vadd.f32 %v331_v58, %v307_v59 }
  0xa6   : > { %v332_v43 = vmul.f32 %v329_v40, %v320_v37 }
  0xa7   : > { %v355_v51 = vpop.permute.xlu0 %354 }
  0xa8   : > { %v336_v49 = vadd.f32 %v332_v43, %v308_v45 }
  0xaa   : > { %v284_v47 = vpop.permute.xlu1 %283  ;;  %v364_v55 = vadd.f32 %v355_v51, %v336_v49 }
  0xab   : > { %v302_v63 = vmul.f32 %v301_v33, %v284_v47  ;;  %v389_v17 = vpop.permute.xlu0 %388 }
  0xac   : > { %v368_v60 = vmax.f32 %v364_v55, 0.0 }
  0xad   : > { %v306_v3 = vadd.f32 %v302_v63, %v274_v62 }
  0xaf   : > { %v360_v52 = vpop.permute.xlu1 %359  ;;  %v399_v19 = vpop.permute.xlu0 %398 }
  0xb0   : > { %v365_v56 = vadd.f32 %v360_v52, %v337_v50 }
  0xb2   : > { %v369_v57 = vmax.f32 %v365_v56, 0.0 }
  0xb3   : > { %v409_v21 = vpop.permute.xlu0 %408 }
  0xb4   : > { %v312_v61 = vpop.permute.xlu1 %311  ;;  %687 = vmatprep.subr.mxu0 %v369_v57  ;;  %707 = vmatprep.subr.mxu1 %v369_v57 }
  0xb5   : > { %688 = vmatpush3.msra.mxu0 %v369_v57  ;;  %711 = vmatpush3.msra.mxu1 %v369_v57  ;;  %v330_v0 = vmul.f32 %v329_v40, %v312_v61 }
  0xb6   : > { %689 = vmatprep.subr.mxu0 %v368_v60  ;;  %708 = vmatprep.subr.mxu1 %v368_v60 }
  0xb7   : > { %690 = vmatpush3.msra.mxu0 %v368_v60  ;;  %712 = vmatpush3.msra.mxu1 %v368_v60  ;;  %v334_v6 = vadd.f32 %v330_v0, %v306_v3  ;;  %v419_v33 = vpop.permute.xlu0 %418 }
  0xb9   : > { %v350_v2 = vpop.permute.xlu1 %349 }
  0xba   : > { %v363_v4 = vadd.f32 %v350_v2, %v335_v1 }
  0xbc   : > { %v367_v5 = vmax.f32 %v363_v4, 0.0 }
  0xbd   : > { %v345_v7 = vpop.permute.xlu1 %344 }
  0xbe   : > { %v362_v8 = vadd.f32 %v345_v7, %v334_v6  ;;  %691 = vmatprep.subr.mxu0 %v367_v5  ;;  %709 = vmatprep.subr.mxu1 %v367_v5 }
  0xbf   : > { %692 = vmatpush3.msra.mxu0 %v367_v5  ;;  %713 = vmatpush3.msra.mxu1 %v367_v5 }
  0xc0   : > { %v366_v9 = vmax.f32 %v362_v8, 0.0 }
  0xc1   : > { %v394_v16 = vpop.permute.xlu1 %393 }
  0xc2   : > { %693 = vmatprep.subr.mxu0 %v366_v9  ;;  %710 = vmatprep.subr.mxu1 %v366_v9 }
  0xc3   : > { %694 = vmatpush3.msra.mxu0 %v366_v9  ;;  %714 = vmatpush3.msra.mxu1 %v366_v9 }
  0xc4   : > { %696 = vmatmul.mubr.msk.f32.vlgmr.msra.gmra.mxu0 %vm426_vm0, %v371_v10  ;;  %702 = vmatmul.mubr.msk.f32.vlgmr.msra.gmra.mxu1 %vm426_vm0, %v375_v11 }
  0xc5   : > { %698 = vmatprep.mubr.msk.f32.mxu0 %vm426_vm0, %v372_v12  ;;  %704 = vmatprep.mubr.msk.f32.mxu1 %vm426_vm0, %v376_v13  ;;  %v404_v18 = vpop.permute.xlu1 %403 }
  0xc8   : > { %699 = vmatmul.mubr.msk.f32.gmra.mxu0 %vm426_vm0, %v373_v14  ;;  %705 = vmatmul.mubr.msk.f32.gmra.mxu1 %vm426_vm0, %v377_v15 }
  0xc9   : > { %v414_v20 = vpop.permute.xlu1 %413 }
  0xcd   : > { %v424_v28 = vpop.permute.xlu1 %423 }
 0x184   : > { %v697_v22 = vpop.f32.mrf.mxu0  ;;  %v703_v23 = vpop.f32.mrf.mxu1 }
 0x185   : > { %v523_v24 = vadd.f32 %v697_v22, %v394_v16  ;;  %v543_v25 = vadd.f32 %v703_v23, %v414_v20 }
 0x186   : > { %v517_v26 = vpop.f32.mrf.mxu0  ;;  %v537_v27 = vpop.f32.mrf.mxu1 }
 0x187   : > { %557 = vst [vmem:[%s237_s17 + $0x8] sm:$0xff] %v523_v24  ;;  %561 = vst [vmem:[%s237_s17 + $0x28] sm:$0xff] %v543_v25  ;;  %v518_v29 = vadd.f32 %v517_v26, %v389_v17  ;;  %v538_v30 = vadd.f32 %v537_v27, %v409_v21 }
 0x188   : > { %v700_v31 = vpop.f32.mrf.mxu0  ;;  %v706_v32 = vpop.f32.mrf.mxu1 }
 0x189   : > { %556 = vst [vmem:[%s237_s17] sm:$0xff] %v518_v29  ;;  %560 = vst [vmem:[%s237_s17 + $0x20] sm:$0xff] %v538_v30  ;;  %v533_v34 = vadd.f32 %v700_v31, %v404_v18  ;;  %v553_v35 = vadd.f32 %v706_v32, %v424_v28 }
 0x18a   : > { %v527_v36 = vpop.f32.mrf.mxu0  ;;  %v547_v37 = vpop.f32.mrf.mxu1 }
 0x18b   : > { %559 = vst [vmem:[%s237_s17 + $0x18] sm:$0xff] %v533_v34  ;;  %563 = vst [vmem:[%s237_s17 + $0x38] sm:$0xff] %v553_v35  ;;  %v528_v38 = vadd.f32 %v527_v36, %v399_v19  ;;  %v548_v39 = vadd.f32 %v547_v37, %v419_v33 }
 0x18d   : > { %558 = vst [vmem:[%s237_s17 + $0x10] sm:$0xff] %v528_v38  ;;  %562 = vst [vmem:[%s237_s17 + $0x30] sm:$0xff] %v548_v39 }
 0x18e   : > { %800 = shalt.err (!%p797_p5)
}
 0x18f   : > { %s801_s12 = scalar_lea.hbm %s1048_s7, 1024  ;;  %s805_s15 = scalar_lea.hbm %s1104_s5, 2048 }
 0x190   : > { %p802_p6 = scmp.ne.s32.totalorder %s1048_s7, %s801_s12  ;;  %p806_p10 = scmp.lt.s32.totalorder %s1048_s7, %s1104_s5 }
 0x191   : > { %p807_p11 = scmp.lt.s32.totalorder %s805_s15, %s801_s12 }
 0x192   : > { %p803_p7 = pnand %p802_p6, %p941_p4 }
 0x193   : > { %p808_p12 = por %p807_p11, %p806_p10 }
 0x194   : > { %p804_p9 = pneg %p803_p7 }
 0x196   : > { %p809_p13 = pnand %p808_p12, %p804_p9 }
 0x198   : > { %812 = shalt.err (!%p809_p13)
}
 0x199   : > { %s869_s24 = smov 128   ;;  %s870_s27 = smov 8  }
 0x19a   : > { %715 = dma.vmem_to_hbm [thread:$0]  (%p941_p4), %s1050_s25, 1024, %s1048_s7, %s1054_s21, %s869_s24, %s869_s24, %s870_s27  }
 0x19b PF: > { %p721_p0 = scmp.ge.s32.totalorder %s863_s23, 2  ;;  %s594_s29 = sand.u32 1, %s843_s18  }
 0x19c   : > { %s595_s8 = scalar_lea.sflag [#allocation3], %s594_s29 }
 0x19d   : > { %p718_p1 = pnand %p721_p0, %p948_p8 }
 0x19f   : > { %p719_p2 = pneg %p718_p1 }
 0x1a1   : > { %838 = dma.done.wait (%p719_p2), %s595_s8, 1024  }
 0x1a2   : > { %840 = vsyncadd (%p719_p2), %s595_s8, 4294966272  ;;  %s18_s23 = sadd.s32 1, %s863_s23   ;;  %s1107_s18 = smov %s847_s19 }
 0x1a3   : > { %p15_p3 = scmp.ge.s32.totalorder %s18_s23, 4   ;;  %s1108_s19 = smov %s851_s20 }
 0x1a4   : > { %s1109_s20 = smov %s954_s6  ;;  %s1110_s21 = smov %s859_s22 }
 0x1a5   : > { %s1111_s22 = smov %s1113_s26  ;;  %17 = sbr.rel (!%p15_p3) target bundleno = 4 (0x4), region = 75 }
 0x1aa   :  { %600 = vsyncpa [#allocation3], 1 }
 0x1ab   :  { %602 = vsyncpa [#allocation3 + $0x1], 1 }

</bundles_post_ra>
